<compile_context>
chip_gen: v7x
topology: tpu7x:2x2x1
jax: 0.10.0
libtpu: 0.0.40
codegen_flags: <defaults>
</compile_context>

<pallas_src>
import jax
import jax.numpy as jnp
from jax.experimental import pallas as pl
from jax.experimental.pallas import tpu as pltpu


def _round_up(x, m):
    return ((x + m - 1) // m) * m


# ----------------------------------------------------------------------------
# Fused kernel: out = relu(relu(relu(relu(x@W1+b1)@W2+b2)@W3+b3)@W4+b4)
# ----------------------------------------------------------------------------
def _autoencoder_kernel(x_ref, w1_ref, b1_ref, w2_ref, b2_ref,
                        w3_ref, b3_ref, w4_ref, b4_ref, o_ref):
    # encoder1
    y = jnp.dot(x_ref[...], w1_ref[...], preferred_element_type=jnp.float32)
    y = jnp.maximum(y + b1_ref[...], 0.0)
    # encoder2
    y = jnp.dot(y.astype(w2_ref.dtype), w2_ref[...],
                preferred_element_type=jnp.float32)
    y = jnp.maximum(y + b2_ref[...], 0.0)
    # decoder1
    y = jnp.dot(y.astype(w3_ref.dtype), w3_ref[...],
                preferred_element_type=jnp.float32)
    y = jnp.maximum(y + b3_ref[...], 0.0)
    # decoder2
    y = jnp.dot(y.astype(w4_ref.dtype), w4_ref[...],
                preferred_element_type=jnp.float32)
    y = jnp.maximum(y + b4_ref[...], 0.0)
    o_ref[...] = y.astype(o_ref.dtype)


def dense_autoencoder_forward(params, x, *, block_m=256):
    """params: (w1,b1,...,w4,b4) with padded/aligned shapes; x: (M, F) f32."""
    w1, b1, w2, b2, w3, b3, w4, b4 = params
    M, F = x.shape
    Fp, H = w1.shape            # padded feature dim, hidden dim (=128)
    assert w4.shape == (H, Fp) and w2.shape == (H, H) and w3.shape == (H, H)

    tm = min(block_m, _round_up(M, 8))
    Mp = _round_up(M, tm)

    xp = x.astype(jnp.bfloat16)
    if (Mp != M) or (Fp != F):
        xp = jnp.pad(xp, ((0, Mp - M), (0, Fp - F)))

    out = pl.pallas_call(
        _autoencoder_kernel,
        out_shape=jax.ShapeDtypeStruct((Mp, Fp), jnp.float32),
        grid_spec=pltpu.PrefetchScalarGridSpec(
            num_scalar_prefetch=0,
            grid=(Mp // tm,),
            in_specs=[
                pl.BlockSpec((tm, Fp), lambda i: (i, 0)),   # x tile
                pl.BlockSpec((Fp, H), lambda i: (0, 0)),    # W1 (resident)
                pl.BlockSpec((1, H), lambda i: (0, 0)),     # b1
                pl.BlockSpec((H, H), lambda i: (0, 0)),     # W2
                pl.BlockSpec((1, H), lambda i: (0, 0)),     # b2
                pl.BlockSpec((H, H), lambda i: (0, 0)),     # W3
                pl.BlockSpec((1, H), lambda i: (0, 0)),     # b3
                pl.BlockSpec((H, Fp), lambda i: (0, 0)),    # W4
                pl.BlockSpec((1, Fp), lambda i: (0, 0)),    # b4
            ],
            out_specs=pl.BlockSpec((tm, Fp), lambda i: (i, 0)),
        ),
        compiler_params=pltpu.CompilerParams(
            dimension_semantics=("parallel",),
        ),
    )(xp, w1, b1, w2, b2, w3, b3, w4, b4)

    if (Mp != M) or (Fp != F):
        out = out[:M, :F]
    return out


# ----------------------------------------------------------------------------
# Parameter construction (deterministic, PyTorch-Linear-like init)
# ----------------------------------------------------------------------------
def make_params(key, nfeatures1, nfeatures2=128):
    Fp = _round_up(nfeatures1, 128)
    dims = [(nfeatures1, nfeatures2),
            (nfeatures2, nfeatures2),
            (nfeatures2, nfeatures2),
            (nfeatures2, nfeatures1)]
    keys = jax.random.split(key, 2 * len(dims))
    kernel_params = []
    ref_params = []
    for li, (din, dout) in enumerate(dims):
        bound = 1.0 / float(din) ** 0.5
        # Stored directly as (din, dout) == torch_weight.T so y = x @ w + b.
        w = jax.random.uniform(keys[2 * li], (din, dout), jnp.float32,
                               -bound, bound)
        b = jax.random.uniform(keys[2 * li + 1], (dout,), jnp.float32,
                               -bound, bound)
        ref_params.append((w, b))
        din_p = Fp if din == nfeatures1 else din
        dout_p = Fp if dout == nfeatures1 else dout
        wp = jnp.zeros((din_p, dout_p), jnp.float32).at[:din, :dout].set(w)
        bp = jnp.zeros((dout_p,), jnp.float32).at[:dout].set(b)
        kernel_params.append(wp.astype(jnp.bfloat16))     # bf16 weights
        kernel_params.append(bp.reshape(1, dout_p))       # f32 bias row
    return tuple(kernel_params), ref_params


def reference_forward(ref_params, x):
    y = x
    for w, b in ref_params:
        y = jnp.maximum(y @ w + b, 0.0)
    return y


if __name__ == "__main__":
    batch = 8
    nfeatures1 = 256    # lane-aligned so no pad/slice copies are needed

    key = jax.random.PRNGKey(0)
    k_params, k_x = jax.random.split(key)

    params, ref_params = make_params(k_params, nfeatures1)
    x = jax.random.normal(k_x, (batch, nfeatures1), jnp.float32)

    out = dense_autoencoder_forward(params, x)
    out = jax.block_until_ready(out)

    assert out.shape == (batch, nfeatures1), out.shape
    assert bool(jnp.all(jnp.isfinite(out)))

    # Loose check vs f32 reference (kernel uses bf16 matmul inputs).
    ref = reference_forward(ref_params, x)
    assert bool(jnp.allclose(out, ref, atol=0.1, rtol=0.1))

    print("KERNEL_OK")
</pallas_src>

<mosaic_0001>
module attributes {stable_mosaic.version = 11 : i64} {
  func.func @_autoencoder_kernel(%arg0: i32, %arg1: memref<8x256xbf16, #tpu.memory_space<vmem>>, %arg2: memref<256x128xbf16, #tpu.memory_space<vmem>>, %arg3: memref<1x128xf32, #tpu.memory_space<vmem>>, %arg4: memref<128x128xbf16, #tpu.memory_space<vmem>>, %arg5: memref<1x128xf32, #tpu.memory_space<vmem>>, %arg6: memref<128x128xbf16, #tpu.memory_space<vmem>>, %arg7: memref<1x128xf32, #tpu.memory_space<vmem>>, %arg8: memref<128x256xbf16, #tpu.memory_space<vmem>>, %arg9: memref<1x256xf32, #tpu.memory_space<vmem>>, %arg10: memref<8x256xf32, #tpu.memory_space<vmem>>) attributes {dimension_semantics = [#tpu.dimension_semantics<parallel>], iteration_bounds = array<i64: 1>, scalar_prefetch = 0 : i64, scratch_operands = 0 : i64, tpu.core_type = #tpu.core_type<tc>, window_params = [{transform_indices = @transform_0, window_bounds = array<i64: 8, 256>}, {pipeline_mode = #tpu.pipeline_mode<synchronous>, transform_indices = @transform_1, window_bounds = array<i64: 256, 128>}, {pipeline_mode = #tpu.pipeline_mode<synchronous>, transform_indices = @transform_2, window_bounds = array<i64: 1, 128>}, {pipeline_mode = #tpu.pipeline_mode<synchronous>, transform_indices = @transform_3, window_bounds = array<i64: 128, 128>}, {pipeline_mode = #tpu.pipeline_mode<synchronous>, transform_indices = @transform_4, window_bounds = array<i64: 1, 128>}, {pipeline_mode = #tpu.pipeline_mode<synchronous>, transform_indices = @transform_5, window_bounds = array<i64: 128, 128>}, {pipeline_mode = #tpu.pipeline_mode<synchronous>, transform_indices = @transform_6, window_bounds = array<i64: 1, 128>}, {pipeline_mode = #tpu.pipeline_mode<synchronous>, transform_indices = @transform_7, window_bounds = array<i64: 128, 256>}, {pipeline_mode = #tpu.pipeline_mode<synchronous>, transform_indices = @transform_8, window_bounds = array<i64: 1, 256>}, {transform_indices = @transform_9, window_bounds = array<i64: 8, 256>}]} {
    %c0 = arith.constant 0 : index
    %c0_0 = arith.constant 0 : index
    %0 = vector.load %arg1[%c0, %c0_0] : memref<8x256xbf16, #tpu.memory_space<vmem>>, vector<8x256xbf16>
    %c0_1 = arith.constant 0 : index
    %c0_2 = arith.constant 0 : index
    %1 = vector.load %arg2[%c0_1, %c0_2] : memref<256x128xbf16, #tpu.memory_space<vmem>>, vector<256x128xbf16>
    %cst = arith.constant dense<0.000000e+00> : vector<8x128xf32>
    %2 = tpu.matmul %0, %1, %cst {dimension_numbers = #tpu.dot_dimension_numbers<[1], [0], [0], [1], [0, 0, 1, 1], [], []>} : vector<8x256xbf16>, vector<256x128xbf16>, vector<8x128xf32> -> vector<8x128xf32>
    %c0_3 = arith.constant 0 : index
    %c0_4 = arith.constant 0 : index
    %3 = vector.load %arg3[%c0_3, %c0_4] : memref<1x128xf32, #tpu.memory_space<vmem>>, vector<1x128xf32>
    %4 = vector.broadcast %3 : vector<1x128xf32> to vector<8x128xf32>
    %5 = arith.addf %2, %4 : vector<8x128xf32>
    %cst_5 = arith.constant 0.000000e+00 : f32
    %6 = vector.broadcast %cst_5 : f32 to vector<8x128xf32>
    %7 = arith.maximumf %5, %6 : vector<8x128xf32>
    %8 = arith.truncf %7 : vector<8x128xf32> to vector<8x128xbf16>
    %c0_6 = arith.constant 0 : index
    %c0_7 = arith.constant 0 : index
    %9 = vector.load %arg4[%c0_6, %c0_7] : memref<128x128xbf16, #tpu.memory_space<vmem>>, vector<128x128xbf16>
    %cst_8 = arith.constant dense<0.000000e+00> : vector<8x128xf32>
    %10 = tpu.matmul %8, %9, %cst_8 {dimension_numbers = #tpu.dot_dimension_numbers<[1], [0], [0], [1], [0, 0, 1, 1], [], []>} : vector<8x128xbf16>, vector<128x128xbf16>, vector<8x128xf32> -> vector<8x128xf32>
    %c0_9 = arith.constant 0 : index
    %c0_10 = arith.constant 0 : index
    %11 = vector.load %arg5[%c0_9, %c0_10] : memref<1x128xf32, #tpu.memory_space<vmem>>, vector<1x128xf32>
    %12 = vector.broadcast %11 : vector<1x128xf32> to vector<8x128xf32>
    %13 = arith.addf %10, %12 : vector<8x128xf32>
    %cst_11 = arith.constant 0.000000e+00 : f32
    %14 = vector.broadcast %cst_11 : f32 to vector<8x128xf32>
    %15 = arith.maximumf %13, %14 : vector<8x128xf32>
    %16 = arith.truncf %15 : vector<8x128xf32> to vector<8x128xbf16>
    %c0_12 = arith.constant 0 : index
    %c0_13 = arith.constant 0 : index
    %17 = vector.load %arg6[%c0_12, %c0_13] : memref<128x128xbf16, #tpu.memory_space<vmem>>, vector<128x128xbf16>
    %cst_14 = arith.constant dense<0.000000e+00> : vector<8x128xf32>
    %18 = tpu.matmul %16, %17, %cst_14 {dimension_numbers = #tpu.dot_dimension_numbers<[1], [0], [0], [1], [0, 0, 1, 1], [], []>} : vector<8x128xbf16>, vector<128x128xbf16>, vector<8x128xf32> -> vector<8x128xf32>
    %c0_15 = arith.constant 0 : index
    %c0_16 = arith.constant 0 : index
    %19 = vector.load %arg7[%c0_15, %c0_16] : memref<1x128xf32, #tpu.memory_space<vmem>>, vector<1x128xf32>
    %20 = vector.broadcast %19 : vector<1x128xf32> to vector<8x128xf32>
    %21 = arith.addf %18, %20 : vector<8x128xf32>
    %cst_17 = arith.constant 0.000000e+00 : f32
    %22 = vector.broadcast %cst_17 : f32 to vector<8x128xf32>
    %23 = arith.maximumf %21, %22 : vector<8x128xf32>
    %24 = arith.truncf %23 : vector<8x128xf32> to vector<8x128xbf16>
    %c0_18 = arith.constant 0 : index
    %c0_19 = arith.constant 0 : index
    %25 = vector.load %arg8[%c0_18, %c0_19] : memref<128x256xbf16, #tpu.memory_space<vmem>>, vector<128x256xbf16>
    %cst_20 = arith.constant dense<0.000000e+00> : vector<8x256xf32>
    %26 = tpu.matmul %24, %25, %cst_20 {dimension_numbers = #tpu.dot_dimension_numbers<[1], [0], [0], [1], [0, 0, 1, 1], [], []>} : vector<8x128xbf16>, vector<128x256xbf16>, vector<8x256xf32> -> vector<8x256xf32>
    %c0_21 = arith.constant 0 : index
    %c0_22 = arith.constant 0 : index
    %27 = vector.load %arg9[%c0_21, %c0_22] : memref<1x256xf32, #tpu.memory_space<vmem>>, vector<1x256xf32>
    %28 = vector.broadcast %27 : vector<1x256xf32> to vector<8x256xf32>
    %29 = arith.addf %26, %28 : vector<8x256xf32>
    %cst_23 = arith.constant 0.000000e+00 : f32
    %30 = vector.broadcast %cst_23 : f32 to vector<8x256xf32>
    %31 = arith.maximumf %29, %30 : vector<8x256xf32>
    %c0_24 = arith.constant 0 : index
    %c0_25 = arith.constant 0 : index
    %32 = vector.load %arg10[%c0_24, %c0_25] : memref<8x256xf32, #tpu.memory_space<vmem>>, vector<8x256xf32>
    tpu.vector_store %arg10[%c0_24, %c0_25], %31 {strides = array<i32>} : memref<8x256xf32, #tpu.memory_space<vmem>>, vector<8x256xf32>,
    return
  }
  func.func @transform_0(%arg0: i32) -> (i32, i32) {
    %c0_i32 = arith.constant 0 : i32
    %c0_i32_0 = arith.constant 0 : i32
    return %arg0, %c0_i32 : i32, i32
  }
  func.func @transform_1(%arg0: i32) -> (i32, i32) {
    %c0_i32 = arith.constant 0 : i32
    %c0_i32_0 = arith.constant 0 : i32
    %c0_i32_1 = arith.constant 0 : i32
    return %c0_i32, %c0_i32_0 : i32, i32
  }
  func.func @transform_2(%arg0: i32) -> (i32, i32) {
    %c0_i32 = arith.constant 0 : i32
    %c0_i32_0 = arith.constant 0 : i32
    %c0_i32_1 = arith.constant 0 : i32
    return %c0_i32, %c0_i32_0 : i32, i32
  }
  func.func @transform_3(%arg0: i32) -> (i32, i32) {
    %c0_i32 = arith.constant 0 : i32
    %c0_i32_0 = arith.constant 0 : i32
    %c0_i32_1 = arith.constant 0 : i32
    return %c0_i32, %c0_i32_0 : i32, i32
  }
  func.func @transform_4(%arg0: i32) -> (i32, i32) {
    %c0_i32 = arith.constant 0 : i32
    %c0_i32_0 = arith.constant 0 : i32
    %c0_i32_1 = arith.constant 0 : i32
    return %c0_i32, %c0_i32_0 : i32, i32
  }
  func.func @transform_5(%arg0: i32) -> (i32, i32) {
    %c0_i32 = arith.constant 0 : i32
    %c0_i32_0 = arith.constant 0 : i32
    %c0_i32_1 = arith.constant 0 : i32
    return %c0_i32, %c0_i32_0 : i32, i32
  }
  func.func @transform_6(%arg0: i32) -> (i32, i32) {
    %c0_i32 = arith.constant 0 : i32
    %c0_i32_0 = arith.constant 0 : i32
    %c0_i32_1 = arith.constant 0 : i32
    return %c0_i32, %c0_i32_0 : i32, i32
  }
  func.func @transform_7(%arg0: i32) -> (i32, i32) {
    %c0_i32 = arith.constant 0 : i32
    %c0_i32_0 = arith.constant 0 : i32
    %c0_i32_1 = arith.constant 0 : i32
    return %c0_i32, %c0_i32_0 : i32, i32
  }
  func.func @transform_8(%arg0: i32) -> (i32, i32) {
    %c0_i32 = arith.constant 0 : i32
    %c0_i32_0 = arith.constant 0 : i32
    %c0_i32_1 = arith.constant 0 : i32
    return %c0_i32, %c0_i32_0 : i32, i32
  }
  func.func @transform_9(%arg0: i32) -> (i32, i32) {
    %c0_i32 = arith.constant 0 : i32
    %c0_i32_0 = arith.constant 0 : i32
    return %arg0, %c0_i32 : i32, i32
  }
}

</mosaic_0001>

<bundles_post_ra>
// kernel: tpu_custom_call.1
= control target key start
LH: loop header
LB: loop body
LE: loop exit
PB: predicated region body
PF: predicated region fallthrough
CT: control target
= control target key end

     0   :  { %14 = vsyncpa [#allocation3], 0  ;;  %s1199_s0 = inlined_call_operand.hbm [shape: bf16[8,256], index: 0, kind: input, shape index: {}]   ;;  %s1200_s1 = inlined_call_operand.hbm [shape: bf16[256,128], index: 1, kind: input, shape index: {}]   ;;  %s1201_s2 = inlined_call_operand.vmem [shape: f32[1,128], index: 2, kind: input, shape index: {}]   ;;  %s1202_s3 = inlined_call_operand.hbm [shape: bf16[128,128], index: 3, kind: input, shape index: {}]   ;;  %s1203_s4 = inlined_call_operand.vmem [shape: f32[1,128], index: 4, kind: input, shape index: {}]   ;;  %s1204_s5 = inlined_call_operand.hbm [shape: bf16[128,128], index: 5, kind: input, shape index: {}]   ;;  %s1205_s6 = inlined_call_operand.vmem [shape: f32[1,128], index: 6, kind: input, shape index: {}]   ;;  %s1206_s7 = inlined_call_operand.hbm [shape: bf16[128,256], index: 7, kind: input, shape index: {}]   ;;  %s1207_s8 = inlined_call_operand.vmem [shape: f32[1,256], index: 8, kind: input, shape index: {}]   ;;  %s1208_s9 = inlined_call_operand.hbm [shape: f32[8,256], index: 9, kind: output, shape index: {}]  }
   0x1   :  { %15 = vsyncpa [#allocation6], 0 }
   0x2   :  { %16 = vsyncpa [#allocation9], 0 }
   0x3   :  { %17 = vsyncpa [#allocation4], 0  ;;  %s1025_s30 = smov [#allocation5]   ;;  %s885_s13 = scalar_lea.hbm %s1200_s1, 2048 }
   0x4   :  { %s33_s10 = sshll.u32 %s1025_s30, 4  ;;  %p886_p0 = scmp.ne.s32.totalorder %s1200_s1, %s885_s13  ;;  %s34_s10 = int_to_ptr.vmem [resolvable:$true] %s33_s10 }
   0x5   :  { %p889_p1 = scmp.lt.u32.totalorder %s885_s13, %s1200_s1 }
   0x7   :  { %p891_p2 = pnand %p889_p1, %p886_p0 }
   0x9   :  { %894 = shalt.err (!%p891_p2)
}
   0xa   :  { %s895_s18 = scalar_lea.vmem %s34_s10, 2048  ;;  %p900_p4 = scmp.lt.s32.totalorder %s34_s10, %s34_s10 }
   0xb   :  { %p896_p3 = scmp.ne.s32.totalorder %s34_s10, %s895_s18  ;;  %p901_p5 = scmp.lt.s32.totalorder %s895_s18, %s895_s18 }
   0xd   :  { %p902_p6 = por %p901_p5, %p900_p4 }
   0xf   :  { %p903_p7 = pnand %p902_p6, %p896_p3 }
  0x11   :  { %906 = shalt.err (!%p903_p7)
}
  0x12   :  { %s1026_s19 = smov 64   ;;  %s1027_s20 = smov 4  }
  0x13   :  { %39 = dma.hbm_to_vmem [thread:$0]  %s1200_s1, 2048, %s34_s10, [#allocation6], %s1026_s19, %s1026_s19, %s1027_s20  }
  0x14   :  { %s1028_s23 = smov [#allocation8]   ;;  %s1029_s25 = smov [#allocation2]  }
  0x15   :  { %s61_s24 = sshll.u32 %s1028_s23, 4  ;;  %s24_s26 = sshll.u32 %s1029_s25, 4  ;;  %s62_s24 = int_to_ptr.vmem [resolvable:$true] %s61_s24  ;;  %s25_s26 = int_to_ptr.vmem [resolvable:$true] %s24_s26 }
  0x16   :  { %s907_s29 = scalar_lea.hbm %s1204_s5, 1024 }
  0x17   :  { %p908_p8 = scmp.ne.s32.totalorder %s1204_s5, %s907_s29  ;;  %p911_p9 = scmp.lt.u32.totalorder %s907_s29, %s1204_s5 }
  0x19   :  { %p913_p10 = pnand %p911_p9, %p908_p8 }
  0x1b   :  { %916 = shalt.err (!%p913_p10)
}
  0x1c   :  { %s917_s1 = scalar_lea.vmem %s62_s24, 1024  ;;  %p922_p12 = scmp.lt.s32.totalorder %s62_s24, %s62_s24 }
  0x1d   :  { %p918_p11 = scmp.ne.s32.totalorder %s62_s24, %s917_s1  ;;  %p923_p13 = scmp.lt.s32.totalorder %s917_s1, %s917_s1 }
  0x1f   :  { %p924_p0 = por %p923_p13, %p922_p12 }
  0x21   :  { %p925_p1 = pnand %p924_p0, %p918_p11 }
  0x23   :  { %928 = shalt.err (!%p925_p1)
}
  0x24   :  { %67 = dma.hbm_to_vmem [thread:$0]  %s1204_s5, 1024, %s62_s24, [#allocation9], %s1026_s19, %s1026_s19, %s1027_s20  }
  0x25   :  { %s929_s17 = scalar_lea.hbm %s1199_s0, 128 }
  0x26   :  { %p930_p2 = scmp.ne.s32.totalorder %s1199_s0, %s929_s17  ;;  %p933_p3 = scmp.lt.u32.totalorder %s929_s17, %s1199_s0 }
  0x28   :  { %p935_p4 = pnand %p933_p3, %p930_p2 }
  0x2a   :  { %938 = shalt.err (!%p935_p4)
}
  0x2b   :  { %s939_s25 = scalar_lea.vmem %s25_s26, 128  ;;  %p944_p6 = scmp.lt.s32.totalorder %s25_s26, %s25_s26 }
  0x2c   :  { %p940_p5 = scmp.ne.s32.totalorder %s25_s26, %s939_s25  ;;  %p945_p7 = scmp.lt.s32.totalorder %s939_s25, %s939_s25 }
  0x2e   :  { %p946_p8 = por %p945_p7, %p944_p6 }
  0x30   :  { %p947_p9 = pnand %p946_p8, %p940_p5 }
  0x32   :  { %950 = shalt.err (!%p947_p9)
}
  0x33   :  { %27 = dma.hbm_to_vmem [thread:$0]  %s1199_s0, 128, %s25_s26, [#allocation3]  }
  0x34   :  { %s1030_s27 = smov [#allocation7]   ;;  %s1031_s29 = smov [#allocation10]  }
  0x35   :  { %s47_s28 = sshll.u32 %s1030_s27, 4  ;;  %s75_s30 = sshll.u32 %s1031_s29, 4  ;;  %s48_s28 = int_to_ptr.vmem [resolvable:$true] %s47_s28  ;;  %s76_s30 = int_to_ptr.vmem [resolvable:$true] %s75_s30 }
  0x36   :  { %s951_s13 = scalar_lea.hbm %s1202_s3, 1024 }
  0x37   :  { %p952_p10 = scmp.ne.s32.totalorder %s1202_s3, %s951_s13  ;;  %p955_p11 = scmp.lt.u32.totalorder %s951_s13, %s1202_s3 }
  0x39   :  { %p957_p12 = pnand %p955_p11, %p952_p10 }
  0x3b   :  { %960 = shalt.err (!%p957_p12)
}
  0x3c   :  { %s961_s0 = scalar_lea.vmem %s48_s28, 1024  ;;  %p966_p0 = scmp.lt.s32.totalorder %s48_s28, %s48_s28 }
  0x3d   :  { %p962_p13 = scmp.ne.s32.totalorder %s48_s28, %s961_s0  ;;  %p967_p1 = scmp.lt.s32.totalorder %s961_s0, %s961_s0 }
  0x3f   :  { %p968_p2 = por %p967_p1, %p966_p0 }
  0x41   :  { %p969_p3 = pnand %p968_p2, %p962_p13 }
  0x43   :  { %972 = shalt.err (!%p969_p3)
}
  0x44   :  { %53 = dma.hbm_to_vmem [thread:$0]  %s1202_s3, 1024, %s48_s28, [#allocation6], %s1026_s19, %s1026_s19, %s1027_s20  }
  0x45   :  { %s973_s21 = scalar_lea.hbm %s1206_s7, 2048 }
  0x46   :  { %p974_p4 = scmp.ne.s32.totalorder %s1206_s7, %s973_s21  ;;  %p977_p5 = scmp.lt.u32.totalorder %s973_s21, %s1206_s7 }
  0x48   :  { %p979_p6 = pnand %p977_p5, %p974_p4 }
  0x4a   :  { %982 = shalt.err (!%p979_p6)
}
  0x4b   :  { %s983_s24 = scalar_lea.vmem %s76_s30, 2048  ;;  %p988_p8 = scmp.lt.s32.totalorder %s76_s30, %s76_s30 }
  0x4c   :  { %p984_p7 = scmp.ne.s32.totalorder %s76_s30, %s983_s24  ;;  %p989_p9 = scmp.lt.s32.totalorder %s983_s24, %s983_s24 }
  0x4e   :  { %p990_p10 = por %p989_p9, %p988_p8 }
  0x50   :  { %p991_p11 = pnand %p990_p10, %p984_p7 }
  0x52   :  { %994 = shalt.err (!%p991_p11)
}
  0x53   :  { %s1032_s3 = smov 128   ;;  %s1033_s19 = smov 8  }
  0x54   :  { %81 = dma.hbm_to_vmem [thread:$0]  %s1206_s7, 2048, %s76_s30, [#allocation9], %s1032_s3, %s1032_s3, %s1033_s19  }
  0x55   :  { %1017 = dma.done.wait [#allocation3], 128  }
  0x56   :  { %1018 = vsyncadd [#allocation3], 4294967168 }
  0x57   :  { %1019 = dma.done.wait [#allocation6], 3072  }
  0x58   :  { %1020 = vsyncadd [#allocation6], 4294964224 }
  0x59   :  { %1021 = dma.done.wait [#allocation9], 3072  }
  0x5a   :  { %1022 = vsyncadd [#allocation9], 4294964224  ;;  %v1034_v0 = vmov 0.0   ;;  %v827_v1 = vld [vmem:[#allocation5 + $0x40] sm:$0xff]   ;;  %v829_v3 = vld [vmem:[#allocation5 + $0x48] sm:$0xff]   ;;  %vm1035_vm0 = vmmov 0  }
  0x5b   :  { %774 = vmatprep.subr.bf16.mxu1 %v1034_v0  ;;  %v828_v2 = vld [vmem:[#allocation5] sm:$0xff]   ;;  %734 = vmatprep.subr.bf16.mxu0 %v827_v1  ;;  %v830_v4 = vld [vmem:[#allocation5 + $0x8] sm:$0xff]   ;;  %v831_v5 = vld [vmem:[#allocation5 + $0x50] sm:$0xff]  }
  0x5c   :  { %735 = vmatpush3.bf16.msra.mxu0 %v828_v2  ;;  %v832_v6 = vld [vmem:[#allocation5 + $0x10] sm:$0xff]   ;;  %v833_v7 = vld [vmem:[#allocation5 + $0x58] sm:$0xff]   ;;  %v835_v9 = vld [vmem:[#allocation5 + $0x60] sm:$0xff]   ;;  %790 = vmatprep.mubr.msk.bf16.mxu1 %vm1035_vm0, %v1034_v0 }
  0x5d   :  { %736 = vmatprep.subr.bf16.mxu0 %v829_v3  ;;  %v834_v8 = vld [vmem:[#allocation5 + $0x18] sm:$0xff]   ;;  %v836_v10 = vld [vmem:[#allocation5 + $0x20] sm:$0xff]   ;;  %v837_v11 = vld [vmem:[#allocation5 + $0x68] sm:$0xff]  }
  0x5e   :  { %v100_v12 = vld [vmem:[#allocation2] sm:$0xff]  ;;  %v845_v14 = vld [vmem:[#allocation7] sm:$0xff]   ;;  %v838_v15 = vld [vmem:[#allocation5 + $0x28] sm:$0xff]  }
  0x5f   :  { %v683_v13 = vcombine.high %v100_v12, %v100_v12  ;;  %v839_v16 = vld [vmem:[#allocation5 + $0x70] sm:$0xff]   ;;  %775 = vmatpush3.bf16.msra.mxu1 %v845_v14  ;;  %v846_v17 = vld [vmem:[#allocation7 + $0x8] sm:$0xff]   ;;  %v841_v19 = vld [vmem:[#allocation5 + $0x78] sm:$0xff]   ;;  %v682_v23 = vcombine.low %v100_v12, %v100_v12  ;;  %v529_v14 = vlaneseq }
  0x60   :  { %737 = vmatpush3.bf16.msra.mxu0 %v830_v4  ;;  %v840_v18 = vld [vmem:[#allocation5 + $0x30] sm:$0xff]   ;;  %776 = vmatprep.subr.bf16.mxu1 %v1034_v0  ;;  %v842_v21 = vld [vmem:[#allocation5 + $0x38] sm:$0xff]   ;;  %v849_v24 = vld [vmem:[#allocation7 + $0x20] sm:$0xff]  }
  0x61   :  { %738 = vmatprep.subr.bf16.mxu0 %v831_v5  ;;  %275 = vmatprep.mubr.bf16.mxu0 %v683_v13  ;;  %v847_v20 = vld [vmem:[#allocation7 + $0x10] sm:$0xff]   ;;  %v848_v22 = vld [vmem:[#allocation7 + $0x18] sm:$0xff]   ;;  %v850_v25 = vld [vmem:[#allocation7 + $0x28] sm:$0xff]   ;;  %v1036_v5 = vmov 0  }
  0x62   :  { %v851_v26 = vld [vmem:[#allocation7 + $0x30] sm:$0xff]   ;;  %v852_v27 = vld [vmem:[#allocation7 + $0x38] sm:$0xff]   ;;  %v853_v28 = vld [vmem:[#allocation8] sm:$0xff]  }
  0x63   :  { %777 = vmatpush3.bf16.msra.mxu1 %v846_v17  ;;  %v854_v29 = vld [vmem:[#allocation8 + $0x8] sm:$0xff]   ;;  %v855_v30 = vld [vmem:[#allocation8 + $0x10] sm:$0xff]   ;;  %v856_v31 = vld [vmem:[#allocation8 + $0x18] sm:$0xff]  }
  0x64   :  { %739 = vmatpush3.bf16.msra.mxu0 %v832_v6  ;;  %778 = vmatprep.subr.bf16.mxu1 %v1034_v0  ;;  %v857_v32 = vld [vmem:[#allocation8 + $0x20] sm:$0xff]   ;;  %v858_v33 = vld [vmem:[#allocation8 + $0x28] sm:$0xff]   ;;  %v681_v35 = vld [vmem:[%s1201_s2] ss:$0 sm:$0xff] }
  0x65   :  { %740 = vmatprep.subr.bf16.mxu0 %v833_v7  ;;  %v859_v43 = vld [vmem:[#allocation8 + $0x30] sm:$0xff]   ;;  %v860_v44 = vld [vmem:[#allocation8 + $0x38] sm:$0xff]   ;;  %v861_v45 = vld [vmem:[#allocation10] ss:$8 sps:$4 sm:$0xff]  }
  0x66   :  { %v863_v46 = vld [vmem:[#allocation10 + $0x4] ss:$8 sps:$4 sm:$0xff]   ;;  %v866_v47 = vld [vmem:[#allocation10 + $0x14] ss:$8 sps:$4 sm:$0xff]   ;;  %v864_v48 = vld [vmem:[#allocation10 + $0x10] ss:$8 sps:$4 sm:$0xff]  }
  0x67   :  { %779 = vmatpush3.bf16.msra.mxu1 %v847_v20  ;;  %v869_v49 = vld [vmem:[#allocation10 + $0x24] ss:$8 sps:$4 sm:$0xff]   ;;  %v867_v50 = vld [vmem:[#allocation10 + $0x20] ss:$8 sps:$4 sm:$0xff]   ;;  %v872_v51 = vld [vmem:[#allocation10 + $0x34] ss:$8 sps:$4 sm:$0xff]  }
  0x68   :  { %741 = vmatpush3.bf16.msra.mxu0 %v834_v8  ;;  %780 = vmatprep.subr.bf16.mxu1 %v1034_v0  ;;  %v870_v52 = vld [vmem:[#allocation10 + $0x30] ss:$8 sps:$4 sm:$0xff]   ;;  %v875_v53 = vld [vmem:[#allocation10 + $0x44] ss:$8 sps:$4 sm:$0xff]   ;;  %v873_v54 = vld [vmem:[#allocation10 + $0x40] ss:$8 sps:$4 sm:$0xff]  }
  0x69   :  { %742 = vmatprep.subr.bf16.mxu0 %v835_v9  ;;  %v878_v55 = vld [vmem:[#allocation10 + $0x54] ss:$8 sps:$4 sm:$0xff]   ;;  %v876_v56 = vld [vmem:[#allocation10 + $0x50] ss:$8 sps:$4 sm:$0xff]   ;;  %v881_v57 = vld [vmem:[#allocation10 + $0x64] ss:$8 sps:$4 sm:$0xff]  }
  0x6a   :  { %v879_v58 = vld [vmem:[#allocation10 + $0x60] ss:$8 sps:$4 sm:$0xff]   ;;  %v700_v59 = vld [vmem:[%s1203_s4] ss:$0 sm:$0xff]  ;;  %v884_v3 = vld [vmem:[#allocation10 + $0x74] ss:$8 sps:$4 sm:$0xff]  }
  0x6b   :  { %781 = vmatpush3.bf16.msra.mxu1 %v848_v22  ;;  %v882_v4 = vld [vmem:[#allocation10 + $0x70] ss:$8 sps:$4 sm:$0xff]  }
  0x6c   :  { %743 = vmatpush3.bf16.msra.mxu0 %v836_v10  ;;  %782 = vmatprep.subr.bf16.mxu1 %v1034_v0  ;;  %v709_v6 = vld [vmem:[%s1205_s6] ss:$0 sm:$0xff]  ;;  %s1037_s6 = smov [#allocation11]  }
  0x6d   :  { %744 = vmatprep.subr.bf16.mxu0 %v837_v11  ;;  %v527_v17 = vld [vmem:[%s1207_s8] sm:$0x3]  ;;  %s670_s13 = sshll.u32 %s1037_s6, 4  ;;  %s671_s13 = int_to_ptr.vmem [resolvable:$true] %s670_s13 }
  0x6e   :  { %s995_s1 = scalar_lea.vmem %s671_s13, 256  ;;  %p1000_p13 = scmp.lt.s32.totalorder %s671_s13, %s671_s13 }
  0x6f   :  { %783 = vmatpush3.bf16.msra.mxu1 %v849_v24  ;;  %p996_p12 = scmp.ne.s32.totalorder %s671_s13, %s995_s1  ;;  %p1001_p0 = scmp.lt.s32.totalorder %s995_s1, %s995_s1 }
  0x70   :  { %745 = vmatpush3.bf16.msra.mxu0 %v838_v15  ;;  %784 = vmatprep.subr.bf16.mxu1 %v1034_v0  ;;  %v530_v15 = vshrl.u32 %v529_v14, 7 }
  0x71   :  { %746 = vmatprep.subr.bf16.mxu0 %v839_v16  ;;  %p1002_p1 = por %p1001_p0, %p1000_p13 }
  0x72   :  { %v531_v16 = vsub.s32 0, %v530_v15 }
  0x73   :  { %785 = vmatpush3.bf16.msra.mxu1 %v850_v25  ;;  %p1003_p2 = pnand %p1002_p1, %p996_p12 }
  0x74   :  { %747 = vmatpush3.bf16.msra.mxu0 %v840_v18  ;;  %786 = vmatprep.subr.bf16.mxu1 %v1034_v0  ;;  %v535_v18 = vsub.s32 1, %v530_v15 }
  0x75   :  { %748 = vmatprep.subr.bf16.mxu0 %v841_v19  ;;  %v532_v19 = vrot.slane %v527_v17, %v531_v16 }
  0x76   :  { %v536_v20 = vrot.slane %v527_v17, %v535_v18 }
  0x77   :  { %787 = vmatpush3.bf16.msra.mxu1 %v851_v26 }
  0x78   :  { %749 = vmatpush3.bf16.msra.mxu0 %v842_v21  ;;  %788 = vmatprep.subr.bf16.mxu1 %v1034_v0 }
  0x79   :  { %794 = vmatprep.subr.bf16.mxu0 %v1034_v0 }
  0x7b   :  { %276 = vmatmul.mubr.bf16.vlgmr.msra.gmra.mrb[0].mxu0 %v682_v23  ;;  %789 = vmatpush3.bf16.msra.mxu1 %v852_v27 }
  0x7c   :  { %810 = vmatprep.mubr.msk.bf16.mxu0 %vm1035_vm0, %v1034_v0  ;;  %795 = vmatpush3.bf16.msra.mxu0 %v853_v28 }
  0x7d   :  { %796 = vmatprep.subr.bf16.mxu0 %v1034_v0  ;;  %619 = vmatprep.subr.bf16.mxu1 %v863_v46 }
  0x80   :  { %797 = vmatpush3.bf16.msra.mxu0 %v854_v29 }
  0x81   :  { %798 = vmatprep.subr.bf16.mxu0 %v1034_v0 }
  0x84   :  { %799 = vmatpush3.bf16.msra.mxu0 %v855_v30 }
  0x85   :  { %800 = vmatprep.subr.bf16.mxu0 %v1034_v0 }
  0x88   :  { %801 = vmatpush3.bf16.msra.mxu0 %v856_v31 }
  0x89   :  { %802 = vmatprep.subr.bf16.mxu0 %v1034_v0 }
  0x8c   :  { %803 = vmatpush3.bf16.msra.mxu0 %v857_v32 }
  0x8d   :  { %804 = vmatprep.subr.bf16.mxu0 %v1034_v0 }
  0x90   :  { %805 = vmatpush3.bf16.msra.mxu0 %v858_v33 }
  0x91   :  { %806 = vmatprep.subr.bf16.mxu0 %v1034_v0 }
  0x94   :  { %807 = vmatpush3.bf16.msra.mxu0 %v859_v43 }
  0x95   :  { %808 = vmatprep.subr.bf16.mxu0 %v1034_v0 }
  0x98   :  { %809 = vmatpush3.bf16.msra.mxu0 %v860_v44 }
 0x14e   :  { %v750_v34 = vpop.f32.mrb[0].mxu0 }
 0x14f   :  { %v751_v36 = vpop.f32.mrb[1].mxu0 }
 0x150   :  { %v752_v37 = vadd.f32 %v751_v36, %v750_v34  ;;  %v753_v38 = vpop.f32.mrb[2].mxu0 }
 0x151   :  { %v754_v39 = vpop.f32.mrb[3].mxu0 }
 0x152   :  { %v278_v40 = vadd.f32 %v752_v37, %v681_v35 }
 0x154   :  { %v283_v41 = vmax.f32 %v278_v40, 0.0 }
 0x156   :  { %v284_v42 = vpack.c.bf16 %v283_v41, %v283_v41 }
 0x158   :  { %791 = vmatmul.mubr.bf16.vlgmr.msra.gmra.mrb[0].mxu1 %v284_v42 }
 0x159   :  { %620 = vmatpush1.bf16.msra.mxu1 %v861_v45  ;;  %651 = vmatprep.mubr.bf16.mxu1 %v1036_v5 }
 0x15a   :  { %621 = vmatprep.subr.bf16.mxu1 %v866_v47 }
 0x15d   :  { %622 = vmatpush1.bf16.msra.mxu1 %v864_v48 }
 0x15e   :  { %623 = vmatprep.subr.bf16.mxu1 %v869_v49 }
 0x161   :  { %624 = vmatpush1.bf16.msra.mxu1 %v867_v50 }
 0x162   :  { %625 = vmatprep.subr.bf16.mxu1 %v872_v51 }
 0x165   :  { %626 = vmatpush1.bf16.msra.mxu1 %v870_v52 }
 0x166   :  { %627 = vmatprep.subr.bf16.mxu1 %v875_v53 }
 0x169   :  { %628 = vmatpush1.bf16.msra.mxu1 %v873_v54 }
 0x16a   :  { %629 = vmatprep.subr.bf16.mxu1 %v878_v55 }
 0x16d   :  { %630 = vmatpush1.bf16.msra.mxu1 %v876_v56 }
 0x16e   :  { %631 = vmatprep.subr.bf16.mxu1 %v881_v57 }
 0x171   :  { %632 = vmatpush1.bf16.msra.mxu1 %v879_v58 }
 0x172   :  { %633 = vmatprep.subr.bf16.mxu1 %v884_v3 }
 0x175   :  { %634 = vmatpush1.bf16.msra.mxu1 %v882_v4 }
 0x22b   :  { %v390_v60 = vpop.f32.mrb[0].mxu1 }
 0x22c   :  { %v391_v61 = vadd.f32 %v700_v59, %v390_v60  ;;  %v792_v62 = vpop.f32.mrb[1].mxu1 }
 0x22d   :  { %v393_v63 = vpop.f32.mrb[2].mxu1 }
 0x22e   :  { %v396_v0 = vmax.f32 %v391_v61, 0.0  ;;  %v793_v1 = vpop.f32.mrb[3].mxu1 }
 0x230   :  { %v397_v2 = vpack.c.bf16 %v396_v0, %v396_v0 }
 0x232   :  { %811 = vmatmul.mubr.bf16.vlgmr.msra.gmra.mrb[4].mxu0 %v397_v2 }
 0x305   :  { %v503_v7 = vpop.f32.mrb[4].mxu0 }
 0x306   :  { %v504_v8 = vadd.f32 %v709_v6, %v503_v7  ;;  %v812_v9 = vpop.f32.mrb[5].mxu0 }
 0x307   :  { %v506_v10 = vpop.f32.mrb[6].mxu0 }
 0x308   :  { %v509_v11 = vmax.f32 %v504_v8, 0.0  ;;  %v813_v12 = vpop.f32.mrb[7].mxu0 }
 0x30a   :  { %v510_v13 = vpack.c.bf16 %v509_v11, %v509_v11 }
 0x30c   :  { %652 = vmatmul.mubr.bf16.vlgmr.msra.gmra.mrb[4].mxu1 %v510_v13 }
 0x3df   :  { %v653_v21 = vpop.f32.mrb[4].mxu1 }
 0x3e0   :  { %v654_v22 = vadd.f32 %v653_v21, %v532_v19  ;;  %v655_v23 = vpop.f32.mrb[5].mxu1 }
 0x3e1   :  { %v656_v24 = vadd.f32 %v655_v23, %v536_v20  ;;  %v657_v25 = vpop.f32.mrb[6].mxu1 }
 0x3e2   :  { %v660_v26 = vmax.f32 %v654_v22, 0.0  ;;  %v658_v27 = vpop.f32.mrb[7].mxu1 }
 0x3e3   :  { %v661_v28 = vmax.f32 %v656_v24, 0.0 }
 0x3e4   :  { %662 = vst [vmem:[#allocation11] sm:$0xff] %v660_v26 }
 0x3e5   :  { %663 = vst [vmem:[#allocation11 + $0x8] sm:$0xff] %v661_v28 }
 0x3e6   :  { %1006 = shalt.err (!%p1003_p2)
}
 0x3e7   :  { %s1007_s14 = scalar_lea.hbm %s1208_s9, 256 }
 0x3e8   :  { %p1008_p3 = scmp.ne.s32.totalorder %s1208_s9, %s1007_s14  ;;  %p1011_p4 = scmp.lt.u32.totalorder %s1007_s14, %s1208_s9 }
 0x3ea   :  { %p1013_p5 = pnand %p1011_p4, %p1008_p3 }
 0x3ec   :  { %1016 = shalt.err (!%p1013_p5)
}
 0x3ed   :  { %673 = dma.vmem_to_hbm [thread:$0]  %s671_s13, 256, %s1208_s9, [#allocation4]  }
 0x3ee   :  { %1023 = dma.done.wait [#allocation4], 256  }
 0x3ef   :  { %1024 = vsyncadd [#allocation4], 4294967040 }
 0x3f0   :  { %677 = vsyncpa [#allocation3], 1 }
 0x3f1   :  { %678 = vsyncpa [#allocation6], 1 }
 0x3f2   :  { %679 = vsyncpa [#allocation9], 1 }
 0x3f3   :  { %680 = vsyncpa [#allocation4], 1 }

</bundles_post_ra>
